<compile_context>
chip_gen: v7x
topology: tpu7x:2x2x1
jax: 0.10.0
libtpu: 0.0.40
codegen_flags: <defaults>
</compile_context>

<pallas_src>
import functools

import numpy as np
import jax
import jax.numpy as jnp
from jax.experimental import pallas as pl
from jax.experimental.pallas import tpu as pltpu


def _round_up(x, m):
    return ((x + m - 1) // m) * m


def pose_loss_kernel(dr_ref, dt_ref, pts_ref, out_ref, acc_ref, *,
                     n_valid, scale, needs_mask):
    i = pl.program_id(0)
    B, _, tm = acc_ref.shape

    @pl.when(i == 0)
    def _init():
        acc_ref[...] = jnp.zeros_like(acc_ref)

    dr = dr_ref[...]            # (B, 3, 3) f32, R_1 - R_2
    dt = dt_ref[...]            # (B, 3)    f32, t_1 - t_2
    pts = pts_ref[...]          # (B, 3, tm) f32, lane-dense model points

    # diff[b, j, m] = sum_k dR[b, j, k] * pts[b, k, m] + dt[b, j]
    # K == 3 is tiny: unrolled VPU contraction (a 3x3 matmul would waste the MXU).
    d0 = dr[:, :, 0][:, :, None]     # (B, 3, 1)
    d1 = dr[:, :, 1][:, :, None]
    d2 = dr[:, :, 2][:, :, None]
    p0 = pts[:, 0, :][:, None, :]    # (B, 1, tm)
    p1 = pts[:, 1, :][:, None, :]
    p2 = pts[:, 2, :][:, None, :]
    diff = dt[:, :, None] + d0 * p0 + d1 * p1 + d2 * p2   # (B, 3, tm)

    sq = diff * diff

    if needs_mask:
        # Zero out contributions from lane padding beyond the true M points.
        lane = jax.lax.broadcasted_iota(jnp.int32, (B, 3, tm), 2)
        sq = jnp.where(i * tm + lane < n_valid, sq, 0.0)

    # Elementwise accumulation across M tiles; keep the XLU cross-lane reduce
    # off the per-tile hot path.
    acc_ref[...] += sq

    @pl.when(i == pl.num_programs(0) - 1)
    def _finalize():
        out_ref[0, 0] = jnp.sum(acc_ref[...]) * scale


def model_pose_loss(R_1, t_1, R_2, t_2, model_points, *, tile_m=512):
    """0.5 * MSE between model_points transformed by (R_1,t_1) and (R_2,t_2)."""
    B, M, K = model_points.shape
    assert K == 3, "model_points must be (..., M, 3)"

    # Algebraic fold (exact): m_1 - m_2 = (R1 - R2) p + (t1 - t2)
    dR = (R_1 - R_2).astype(jnp.float32)                  # (B, 3, 3)
    dt = (t_1 - t_2).astype(jnp.float32)                  # (B, 3)

    # Lane-dense layout: (B, M, 3) -> (B, 3, M); pad M to a 128-multiple tile.
    pts_t = jnp.transpose(model_points.astype(jnp.float32), (0, 2, 1))

    tm = min(tile_m, _round_up(M, 128))                   # tile lane width (mult of 128)
    m_pad = _round_up(M, tm)
    if m_pad != M:
        pts_t = jnp.pad(pts_t, ((0, 0), (0, 0), (0, m_pad - M)))
    n_tiles = m_pad // tm

    scale = 0.5 / float(B * M * 3)                        # 0.5 * (1 / n_elems), static

    kernel = functools.partial(
        pose_loss_kernel, n_valid=M, scale=scale, needs_mask=(m_pad != M))

    out = pl.pallas_call(
        kernel,
        out_shape=jax.ShapeDtypeStruct((1, 1), jnp.float32),
        grid_spec=pltpu.PrefetchScalarGridSpec(
            num_scalar_prefetch=0,
            grid=(n_tiles,),
            in_specs=[
                # dR / dt: same block every step -> resident, DMA'd once.
                pl.BlockSpec((B, 3, 3), lambda i: (0, 0, 0)),
                pl.BlockSpec((B, 3), lambda i: (0, 0)),
                # points: one lane-dense tile of M per grid step (pipelined).
                pl.BlockSpec((B, 3, tm), lambda i: (0, 0, i)),
            ],
            out_specs=pl.BlockSpec(memory_space=pltpu.MemorySpace.SMEM),
            scratch_shapes=[pltpu.VMEM((B, 3, tm), jnp.float32)],
        ),
        compiler_params=pltpu.CompilerParams(
            dimension_semantics=("arbitrary",),   # reduction axis over M tiles
            vmem_limit_bytes=32 * 1024 * 1024,
        ),
    )(dR, dt, pts_t)
    return out[0, 0]


def _reference(R_1, t_1, R_2, t_2, model_points):
    m1 = jnp.einsum('...jk,...mk->...mj', R_1, model_points) + t_1[..., None, :]
    m2 = jnp.einsum('...jk,...mk->...mj', R_2, model_points) + t_2[..., None, :]
    return 0.5 * jnp.mean((m1 - m2) ** 2)


if __name__ == "__main__":
    B, M = 2, 8
    key = jax.random.PRNGKey(0)
    k1, k2, k3, k4, k5 = jax.random.split(key, 5)

    R_1 = jax.random.normal(k1, (B, 3, 3), dtype=jnp.float32)
    t_1 = jax.random.normal(k2, (B, 3), dtype=jnp.float32)
    R_2 = jax.random.normal(k3, (B, 3, 3), dtype=jnp.float32)
    t_2 = jax.random.normal(k4, (B, 3), dtype=jnp.float32)
    model_points = jax.random.normal(k5, (B, M, 3), dtype=jnp.float32)

    loss = model_pose_loss(R_1, t_1, R_2, t_2, model_points)
    loss = jax.block_until_ready(loss)

    ref = jax.block_until_ready(_reference(R_1, t_1, R_2, t_2, model_points))
    assert np.allclose(np.asarray(loss), np.asarray(ref), rtol=1e-5, atol=1e-5), (
        f"mismatch: pallas={loss} ref={ref}")

    print("KERNEL_OK")
</pallas_src>

<mosaic_0001>
module attributes {stable_mosaic.version = 11 : i64} {
  func.func @pose_loss_kernel(%arg0: i32, %arg1: memref<2x3x3xf32, #tpu.memory_space<vmem>>, %arg2: memref<2x3xf32, #tpu.memory_space<vmem>>, %arg3: memref<2x3x128xf32, #tpu.memory_space<vmem>>, %arg4: memref<1x1xf32, #tpu.memory_space<smem>>, %arg5: memref<2x3x128xf32, #tpu.memory_space<vmem>>) attributes {dimension_semantics = [#tpu.dimension_semantics<arbitrary>], iteration_bounds = array<i64: 1>, scalar_prefetch = 0 : i64, scratch_operands = 1 : i64, tpu.core_type = #tpu.core_type<tc>, window_params = [{pipeline_mode = #tpu.pipeline_mode<synchronous>, transform_indices = @transform_0, window_bounds = array<i64: 2, 3, 3>}, {pipeline_mode = #tpu.pipeline_mode<synchronous>, transform_indices = @transform_1, window_bounds = array<i64: 2, 3>}, {transform_indices = @transform_2, window_bounds = array<i64: 2, 3, 128>}, {transform_indices = @transform_3, window_bounds = array<i64: 1, 1>}]} {
    %c0_i32 = arith.constant 0 : i32
    %0 = arith.cmpi eq, %arg0, %c0_i32 : i32
    %1 = arith.extui %0 : i1 to i32
    %c0_i32_0 = arith.constant 0 : i32
    %2 = arith.cmpi ne, %1, %c0_i32_0 : i32
    scf.if %2 {
      %cst_16 = arith.constant 0.000000e+00 : f32
      %53 = vector.broadcast %cst_16 : f32 to vector<2x3x128xf32>
      %c0_17 = arith.constant 0 : index
      %c0_18 = arith.constant 0 : index
      %c0_19 = arith.constant 0 : index
      %54 = vector.load %arg5[%c0_17, %c0_18, %c0_19] : memref<2x3x128xf32, #tpu.memory_space<vmem>>, vector<2x3x128xf32>
      tpu.vector_store %arg5[%c0_17, %c0_18, %c0_19], %53 {strides = array<i32>} : memref<2x3x128xf32, #tpu.memory_space<vmem>>, vector<2x3x128xf32>,
    } else {
    }
    %c0 = arith.constant 0 : index
    %c0_1 = arith.constant 0 : index
    %c0_2 = arith.constant 0 : index
    %3 = vector.load %arg1[%c0, %c0_1, %c0_2] : memref<2x3x3xf32, #tpu.memory_space<vmem>>, vector<2x3x3xf32>
    %c0_3 = arith.constant 0 : index
    %c0_4 = arith.constant 0 : index
    %4 = vector.load %arg2[%c0_3, %c0_4] : memref<2x3xf32, #tpu.memory_space<vmem>>, vector<2x3xf32>
    %c0_5 = arith.constant 0 : index
    %c0_6 = arith.constant 0 : index
    %c0_7 = arith.constant 0 : index
    %5 = vector.load %arg3[%c0_5, %c0_6, %c0_7] : memref<2x3x128xf32, #tpu.memory_space<vmem>>, vector<2x3x128xf32>
    %6 = vector.extract_strided_slice %3 {offsets = [0, 0, 0], sizes = [2, 3, 1], strides = [1, 1, 1]} : vector<2x3x3xf32> to vector<2x3x1xf32>
    %7 = vector.shape_cast %6 : vector<2x3x1xf32> to vector<2x3xf32>
    %8 = vector.shape_cast %7 : vector<2x3xf32> to vector<2x3x1xf32>
    %9 = vector.extract_strided_slice %3 {offsets = [0, 0, 1], sizes = [2, 3, 1], strides = [1, 1, 1]} : vector<2x3x3xf32> to vector<2x3x1xf32>
    %10 = vector.shape_cast %9 : vector<2x3x1xf32> to vector<2x3xf32>
    %11 = vector.shape_cast %10 : vector<2x3xf32> to vector<2x3x1xf32>
    %12 = vector.extract_strided_slice %3 {offsets = [0, 0, 2], sizes = [2, 3, 1], strides = [1, 1, 1]} : vector<2x3x3xf32> to vector<2x3x1xf32>
    %13 = vector.shape_cast %12 : vector<2x3x1xf32> to vector<2x3xf32>
    %14 = vector.shape_cast %13 : vector<2x3xf32> to vector<2x3x1xf32>
    %15 = vector.extract_strided_slice %5 {offsets = [0, 0, 0], sizes = [2, 1, 128], strides = [1, 1, 1]} : vector<2x3x128xf32> to vector<2x1x128xf32>
    %16 = vector.shape_cast %15 : vector<2x1x128xf32> to vector<2x128xf32>
    %17 = vector.shape_cast %16 : vector<2x128xf32> to vector<2x1x128xf32>
    %18 = vector.extract_strided_slice %5 {offsets = [0, 1, 0], sizes = [2, 1, 128], strides = [1, 1, 1]} : vector<2x3x128xf32> to vector<2x1x128xf32>
    %19 = vector.shape_cast %18 : vector<2x1x128xf32> to vector<2x128xf32>
    %20 = vector.shape_cast %19 : vector<2x128xf32> to vector<2x1x128xf32>
    %21 = vector.extract_strided_slice %5 {offsets = [0, 2, 0], sizes = [2, 1, 128], strides = [1, 1, 1]} : vector<2x3x128xf32> to vector<2x1x128xf32>
    %22 = vector.shape_cast %21 : vector<2x1x128xf32> to vector<2x128xf32>
    %23 = vector.shape_cast %22 : vector<2x128xf32> to vector<2x1x128xf32>
    %24 = vector.shape_cast %4 : vector<2x3xf32> to vector<2x3x1xf32>
    %25 = vector.broadcast %8 : vector<2x3x1xf32> to vector<2x3x128xf32>
    %26 = vector.broadcast %17 : vector<2x1x128xf32> to vector<2x3x128xf32>
    %27 = arith.mulf %25, %26 : vector<2x3x128xf32>
    %28 = vector.broadcast %24 : vector<2x3x1xf32> to vector<2x3x128xf32>
    %29 = arith.addf %28, %27 : vector<2x3x128xf32>
    %30 = vector.broadcast %11 : vector<2x3x1xf32> to vector<2x3x128xf32>
    %31 = vector.broadcast %20 : vector<2x1x128xf32> to vector<2x3x128xf32>
    %32 = arith.mulf %30, %31 : vector<2x3x128xf32>
    %33 = arith.addf %29, %32 : vector<2x3x128xf32>
    %34 = vector.broadcast %14 : vector<2x3x1xf32> to vector<2x3x128xf32>
    %35 = vector.broadcast %23 : vector<2x1x128xf32> to vector<2x3x128xf32>
    %36 = arith.mulf %34, %35 : vector<2x3x128xf32>
    %37 = arith.addf %33, %36 : vector<2x3x128xf32>
    %38 = arith.mulf %37, %37 : vector<2x3x128xf32>
    %39 = tpu.iota {dimensions = array<i32: 2>} : vector<2x3x128xi32>
    %c128_i32 = arith.constant 128 : i32
    %40 = arith.muli %arg0, %c128_i32 : i32
    %41 = vector.broadcast %40 : i32 to vector<2x3x128xi32>
    %42 = arith.addi %41, %39 : vector<2x3x128xi32>
    %c8_i32 = arith.constant 8 : i32
    %43 = vector.broadcast %c8_i32 : i32 to vector<2x3x128xi32>
    %44 = arith.cmpi slt, %42, %43 : vector<2x3x128xi32>
    %cst = arith.constant 0.000000e+00 : f32
    %45 = vector.broadcast %cst : f32 to vector<2x3x128xf32>
    %46 = arith.select %44, %38, %45 : vector<2x3x128xi1>, vector<2x3x128xf32>
    %c0_8 = arith.constant 0 : index
    %c0_9 = arith.constant 0 : index
    %c0_10 = arith.constant 0 : index
    %47 = vector.load %arg5[%c0_8, %c0_9, %c0_10] : memref<2x3x128xf32, #tpu.memory_space<vmem>>, vector<2x3x128xf32>
    %48 = arith.addf %47, %46 : vector<2x3x128xf32>
    %c0_11 = arith.constant 0 : index
    %c0_12 = arith.constant 0 : index
    %c0_13 = arith.constant 0 : index
    %49 = vector.load %arg5[%c0_11, %c0_12, %c0_13] : memref<2x3x128xf32, #tpu.memory_space<vmem>>, vector<2x3x128xf32>
    tpu.vector_store %arg5[%c0_11, %c0_12, %c0_13], %48 {strides = array<i32>} : memref<2x3x128xf32, #tpu.memory_space<vmem>>, vector<2x3x128xf32>,
    %c0_i32_14 = arith.constant 0 : i32
    %50 = arith.cmpi eq, %arg0, %c0_i32_14 : i32
    %51 = arith.extui %50 : i1 to i32
    %c0_i32_15 = arith.constant 0 : i32
    %52 = arith.cmpi ne, %51, %c0_i32_15 : i32
    scf.if %52 {
      %c0_16 = arith.constant 0 : index
      %c0_17 = arith.constant 0 : index
      %c0_18 = arith.constant 0 : index
      %53 = vector.load %arg5[%c0_16, %c0_17, %c0_18] : memref<2x3x128xf32, #tpu.memory_space<vmem>>, vector<2x3x128xf32>
      %54 = vector.shape_cast %53 : vector<2x3x128xf32> to vector<1x2x3x128xf32>
      %cst_19 = arith.constant dense<0.000000e+00> : vector<1xf32>
      %55 = vector.multi_reduction <add>, %54, %cst_19 [1, 2, 3] : vector<1x2x3x128xf32> to vector<1xf32>
      %56 = vector.shape_cast %55 : vector<1xf32> to vector<1x1x1x1xf32>
      %57 = vector.extract %56[0, 0, 0, 0] : f32 from vector<1x1x1x1xf32>
      %cst_20 = arith.constant 0.010416667 : f32
      %58 = arith.mulf %57, %cst_20 : f32
      %c0_21 = arith.constant 0 : index
      %c0_22 = arith.constant 0 : index
      %59 = memref.load %arg4[%c0_21, %c0_22] : memref<1x1xf32, #tpu.memory_space<smem>>
      memref.store %58, %arg4[%c0_21, %c0_22] : memref<1x1xf32, #tpu.memory_space<smem>>
    } else {
    }
    return
  }
  func.func @transform_0(%arg0: i32) -> (i32, i32, i32) {
    %c0_i32 = arith.constant 0 : i32
    %c0_i32_0 = arith.constant 0 : i32
    %c0_i32_1 = arith.constant 0 : i32
    %c0_i32_2 = arith.constant 0 : i32
    return %c0_i32, %c0_i32_0, %c0_i32_1 : i32, i32, i32
  }
  func.func @transform_1(%arg0: i32) -> (i32, i32) {
    %c0_i32 = arith.constant 0 : i32
    %c0_i32_0 = arith.constant 0 : i32
    %c0_i32_1 = arith.constant 0 : i32
    return %c0_i32, %c0_i32_0 : i32, i32
  }
  func.func @transform_2(%arg0: i32) -> (i32, i32, i32) {
    %c0_i32 = arith.constant 0 : i32
    %c0_i32_0 = arith.constant 0 : i32
    %c0_i32_1 = arith.constant 0 : i32
    return %c0_i32, %c0_i32_0, %arg0 : i32, i32, i32
  }
  func.func @transform_3(%arg0: i32) -> (i32, i32) {
    %c0_i32 = arith.constant 0 : i32
    %c0_i32_0 = arith.constant 0 : i32
    %c0_i32_1 = arith.constant 0 : i32
    return %c0_i32, %c0_i32_0 : i32, i32
  }
}

</mosaic_0001>

<bundles_post_ra>
// kernel: tpu_custom_call.1
= control target key start
LH: loop header
LB: loop body
LE: loop exit
PB: predicated region body
PF: predicated region fallthrough
CT: control target
= control target key end

     0   :  { %v26_v1 = vlaneseq  ;;  %v175_v2 = vmov 1   ;;  %v176_v3 = vmov 0   ;;  %s227_s0 = inlined_call_operand.vmem [shape: f32[2,3,3], index: 0, kind: input, shape index: {}]   ;;  %s228_s1 = inlined_call_operand.vmem [shape: f32[2,3], index: 1, kind: input, shape index: {}]   ;;  %s229_s2 = inlined_call_operand.vmem [shape: f32[2,3,128], index: 2, kind: input, shape index: {}]   ;;  %s230_s3 = inlined_call_operand.hbm [shape: f32[1,1], index: 3, kind: output, shape index: {}]  }
   0x1   :  { %v21_v0 = vld [vmem:[%s227_s0] sm:$0x7]  ;;  %160 = vset.pattern.permute.xlu1 %v175_v2  ;;  %159 = vset.pattern.permute.xlu0 %v176_v3 }
   0x2   :  { %63 = vperm.xlu1 %160, %v21_v0   ;;  %42 = vperm.xlu0 %159, %v21_v0  }
   0x3   :  { %8 = vsyncpa [#allocation4], 0  ;;  %v22_v4 = vld [vmem:[%s227_s0 + $0x4] sm:$0x7]  ;;  %v27_v5 = vshrl.u32 %v26_v1, 7  ;;  %v177_v9 = vmov 2  }
   0x4   :  { %v23_v8 = vld [vmem:[%s228_s1] sm:$0x3]  ;;  %v178_v12 = vmov 0.0   ;;  %v25_v18 = vld [vmem:[%s229_s2 + $0x4] sm:$0x7]  ;;  %v105_v36 = vand.u32 127, %v26_v1 }
   0x5   :  { %v28_v6 = vsub.s32 0, %v27_v5  ;;  %v35_v7 = vsub.s32 1, %v27_v5  ;;  %19 = vst [vmem:[#allocation2] sm:$0x7] %v178_v12  ;;  %20 = vst [vmem:[#allocation2 + $0x4] sm:$0x7] %v178_v12 }
   0x6   :  { %67 = vperm.xlu1 %160, %v22_v4   ;;  %47 = vperm.xlu0 %159, %v22_v4   ;;  %v24_v17 = vld [vmem:[%s229_s2] sm:$0x7]  ;;  %v92_v21 = vsub.s32 2, %v27_v5  ;;  %vm109_vm0 = vcmp.lt.s32.totalorder %v105_v36, 8  ;;  %vm123_vm1 = vcmask 1042432   ;;  %s163_s23 = scalar_lea.hbm %s230_s3, 16 }
   0x7   :  { %v29_v10 = vrot.slane %v23_v8, %v28_v6  ;;  %v36_v11 = vrot.slane %v23_v8, %v35_v7  ;;  %v53_v19 = vrot.slane %v24_v17, %v28_v6  ;;  %v57_v20 = vrot.slane %v25_v18, %v28_v6  ;;  %p164_p0 = scmp.ne.s32.totalorder %s230_s3, %s163_s23  ;;  %p167_p1 = scmp.lt.u32.totalorder %s163_s23, %s230_s3 }
   0x8   :  { %v73_v24 = vrot.slane %v24_v17, %v35_v7  ;;  %v77_v25 = vrot.slane %v25_v18, %v35_v7  ;;  %v97_v28 = vrot.slane %v25_v18, %v92_v21  ;;  %v93_v29 = vrot.slane %v24_v17, %v92_v21 }
   0x9   :  { %p169_p2 = pnand %p167_p1, %p164_p0 }
   0xa   :  { %162 = vset.pattern.permute.xlu1 %v177_v9  ;;  %161 = vset.pattern.permute.xlu0 %v177_v9 }
   0xb   :  { %87 = vperm.xlu1 %162, %v22_v4   ;;  %83 = vperm.xlu0 %161, %v21_v0  }
   0xc   :  { %v112_v44 = vld [vmem:[#allocation2] sm:$0x7]  ;;  %v113_v46 = vld [vmem:[#allocation2 + $0x4] sm:$0x7] }
   0xf   :  { %31 = vbcast.lane.b32.xlu1 %v29_v10, 256  ;;  %38 = vbcast.lane.b32.xlu0 %v36_v11, 256 }
  0x81   :  { %v64_v13 = vpop.permute.xlu1 %63  ;;  %v43_v14 = vpop.permute.xlu0 %42 }
  0x82   :  { %v58_v26 = vmul.f32 %v53_v19, %v43_v14  ;;  %v78_v32 = vmul.f32 %v73_v24, %v64_v13 }
  0x85   :  { %v68_v15 = vpop.permute.xlu1 %67  ;;  %v48_v16 = vpop.permute.xlu0 %47 }
  0x86   :  { %v59_v27 = vmul.f32 %v57_v20, %v48_v16  ;;  %v79_v33 = vmul.f32 %v77_v25, %v68_v15 }
  0x8a   :  { %v88_v22 = vpop.permute.xlu1 %87  ;;  %v84_v23 = vpop.permute.xlu0 %83 }
  0x8b   :  { %v99_v37 = vmul.f32 %v97_v28, %v88_v22  ;;  %v98_v38 = vmul.f32 %v93_v29, %v84_v23 }
  0x8e   :  { %v32_v30 = vpop.permute.xlu1 %31  ;;  %v39_v31 = vpop.permute.xlu0 %38 }
  0x8f   :  { %v60_v34 = vadd.f32 %v58_v26, %v32_v30  ;;  %v61_v35 = vadd.f32 %v59_v27, %v39_v31 }
  0x91   :  { %v80_v39 = vadd.f32 %v78_v32, %v60_v34  ;;  %v81_v40 = vadd.f32 %v79_v33, %v61_v35 }
  0x93   :  { %v100_v41 = vadd.f32 %v98_v38, %v80_v39  ;;  %v101_v42 = vadd.f32 %v99_v37, %v81_v40 }
  0x95   :  { %v102_v43 = vmul.f32 %v100_v41, %v100_v41  ;;  %v103_v45 = vmul.f32 %v101_v42, %v101_v42 }
  0x97   :  { %v110_v47 = vsel %vm109_vm0, %v102_v43, 0.0  ;;  %v111_v48 = vsel %vm109_vm0, %v103_v45, 0.0 }
  0x98   :  { %v114_v49 = vadd.f32 %v112_v44, %v110_v47  ;;  %v115_v50 = vadd.f32 %v113_v46, %v111_v48 }
  0x9a   :  { %116 = vst [vmem:[#allocation2] sm:$0x7] %v114_v49  ;;  %117 = vst [vmem:[#allocation2 + $0x4] sm:$0x7] %v115_v50 }
  0xa1   :  { %v121_v51 = vld [vmem:[#allocation2] sm:$0x7]  ;;  %v122_v52 = vld [vmem:[#allocation2 + $0x4] sm:$0x7] }
  0xa2   :  { %v124_v53 = vsel %vm123_vm1, %v121_v51, 0.0  ;;  %v125_v54 = vsel %vm123_vm1, %v122_v52, 0.0 }
  0xa3   :  { %v126_v55 = vadd.f32 %v125_v54, %v124_v53 }
  0xa5   :  { %127 = vadd.xlane.f32.xlu1 %v126_v55 }
 0x132   :  { %v128_v56 = vpop.xlane.xlu1 %127 }
 0x133   :  { %v129_v57 = vrot.slane %v128_v56, 4 }
 0x135   :  { %v130_v58 = vadd.f32 %v129_v57, %v128_v56 }
 0x137   :  { %v131_v59 = vrot.slane %v130_v58, 2 }
 0x139   :  { %v132_v60 = vadd.f32 %v131_v59, %v130_v58 }
 0x13b   :  { %v133_v61 = vrot.slane %v132_v60, 1 }
 0x13d   :  { %v134_v62 = vadd.f32 %v133_v61, %v132_v60 }
 0x13f   :  { %152 = vpush %v134_v62 }
 0x170   :  { %s153_s2 = spop %152 }
 0x171   :  { %s136_s20 = smul.f32 0.010416667, %s153_s2 }
 0x173   :  { %138 = sst [smem:[#allocation3]] %s136_s20 }
 0x174   :  { %172 = shalt.err (!%p169_p2)
}
 0x175   :  { %s179_s28 = smov [#allocation3]  }
 0x176   :  { %146 = dma.smem_to_hbm %s179_s28, 16, %s230_s3, [#allocation4]  }
 0x177   :  { %173 = dma.done.wait [#allocation4], 16  }
 0x178   :  { %174 = vsyncadd [#allocation4], 4294967280 }
 0x179   :  { %150 = sfence }
 0x17a   :  { %151 = vsyncpa [#allocation4], 1 }

</bundles_post_ra>
